<compile_context>
chip_gen: v6e
topology: v6e:2x2x1
jax: 0.10.0
libtpu: 0.0.40
codegen_flags: <defaults>
</compile_context>

<pallas_src>
import jax
import jax.numpy as jnp
from jax.experimental import pallas as pl
from jax.experimental.pallas import tpu as pltpu


# ----------------------------- tiling helper ----------------------------------
def _choose_tiles(n, c, hw, itemsize, budget_bytes=4 * 1024 * 1024):
    """Pick (tn, thw): a lane-dense HW tile (multiple of 128 when possible) and a
    batch tile so one (tn, c, thw) block stays under ~4 MiB, keeping double-
    buffered in+out blocks well inside the v5e/v6e/v7x scoped-VMEM budget."""
    hw_tiles = [t for t in (2048, 1024, 512, 256, 128) if hw % t == 0] or [hw]
    n_tiles = [t for t in range(n, 0, -1) if n % t == 0]
    for thw in hw_tiles:            # prefer the widest lane tile that fits
        for tn in n_tiles:          # then the largest batch tile
            if tn * c * thw * itemsize <= budget_bytes:
                return tn, thw
    return 1, hw_tiles[-1]


# ----------------------------- Pallas kernels ----------------------------------
def stats_kernel(x_ref, y_ref, w_ref, sums_ref, gb_ref):
    """Pass 1: stream (TN, C, THW) tiles, accumulate per-channel sum / sum-sq,
    and run the tiny conditional-embedding matmul exactly once.

    x_ref:    (TN, C, THW)  activation tile (native dtype), HW on lanes
    y_ref:    (N, K)        condition vectors (full, fetched once)
    w_ref:    (K, 2C)       spectral-normalized 1x1-conv weight, transposed
    sums_ref: (C, 2)  f32   resident accumulator: [:, 0]=sum(x), [:, 1]=sum(x*x)
    gb_ref:   (N, 2C) f32   resident embed output  y @ W^T
    """
    ni = pl.program_id(0)
    hi = pl.program_id(1)

    @pl.when(jnp.logical_and(ni == 0, hi == 0))
    def _init():
        sums_ref[...] = jnp.zeros_like(sums_ref)
        # ~0 FLOPs: issue the MXU matmul once instead of once per streamed tile.
        gb_ref[...] = jnp.dot(y_ref[...], w_ref[...],
                              preferred_element_type=jnp.float32)

    # Accumulate statistics in f32 regardless of activation dtype (bf16-safe).
    xf = x_ref[...].astype(jnp.float32)                       # (TN, C, THW)
    px = jnp.sum(xf, axis=0)                                  # (C, THW)
    pxx = jnp.sum(xf * xf, axis=0)                            # (C, THW)
    sums_ref[:, 0:1] += jnp.sum(px, axis=1, keepdims=True)    # (C, 1)
    sums_ref[:, 1:2] += jnp.sum(pxx, axis=1, keepdims=True)   # (C, 1)


def apply_kernel(x_ref, scale_ref, shift_ref, o_ref):
    """Pass 2: lane-dense streamed apply; one FMA per element.
    scale/shift are per-(n, c) f32 vectors broadcast over the HW (lane) axis."""
    o_ref[...] = (x_ref[...] * scale_ref[...] + shift_ref[...]).astype(o_ref.dtype)


# ----------------------------- wrapper ----------------------------------------
def cbn2d_forward(x_nchw, y, w_sn, *, eps: float = 1e-5):
    """x_nchw: (N, C, H, W), y: (N, K), w_sn: (2C, K) spectral-normalized."""
    N, C, H, W = x_nchw.shape
    K = y.shape[1]
    HW = H * W

    # Native layout: (N, C, HW) -- contiguous reshape, no transpose, no extra
    # HBM passes; HW lands on the TPU lane axis.
    x = x_nchw.reshape(N, C, HW)
    w_t = jnp.transpose(w_sn)                   # (K, 2C) -- tiny
    tn, thw = _choose_tiles(N, C, HW, x.dtype.itemsize)
    n_blocks, hw_blocks = N // tn, HW // thw

    # ---- Pass 1: per-channel batch statistics + embed matmul (run once) ----
    sums, gb = pl.pallas_call(
        stats_kernel,
        out_shape=(jax.ShapeDtypeStruct((C, 2), jnp.float32),
                   jax.ShapeDtypeStruct((N, 2 * C), jnp.float32)),
        grid_spec=pltpu.PrefetchScalarGridSpec(
            num_scalar_prefetch=0,
            grid=(n_blocks, hw_blocks),
            in_specs=[
                pl.BlockSpec((tn, C, thw), lambda ni, hi: (ni, 0, hi)),
                pl.BlockSpec((N, K), lambda ni, hi: (0, 0)),
                pl.BlockSpec((K, 2 * C), lambda ni, hi: (0, 0)),
            ],
            out_specs=[pl.BlockSpec((C, 2), lambda ni, hi: (0, 0)),
                       pl.BlockSpec((N, 2 * C), lambda ni, hi: (0, 0))],
        ),
        compiler_params=pltpu.CompilerParams(
            dimension_semantics=("arbitrary", "arbitrary")),
    )(x, y, w_t)

    # ---- Fold BN stats + conditional affine into per-(n, c) scale/shift ----
    # Tiny (N, C) math kept out of the streamed per-tile path (per perf review).
    count = jnp.float32(N * HW)
    mean = sums[:, 0] / count                        # (C,)
    var = sums[:, 1] / count - mean * mean           # biased (training-mode) var
    inv_std = jax.lax.rsqrt(var + eps)               # (C,)
    gamma = gb[:, :C]                                # (N, C)
    beta = gb[:, C:]                                 # (N, C)
    scale = (1.0 + gamma) * inv_std                  # (N, C)
    shift = beta - mean * scale                      # (N, C)
    scale3 = scale[:, :, None].astype(jnp.float32)   # (N, C, 1)
    shift3 = shift[:, :, None].astype(jnp.float32)   # (N, C, 1)

    # ---- Pass 2: streamed lane-dense apply: out = x * scale + shift ----
    out = pl.pallas_call(
        apply_kernel,
        out_shape=jax.ShapeDtypeStruct((N, C, HW), x_nchw.dtype),
        grid_spec=pltpu.PrefetchScalarGridSpec(
            num_scalar_prefetch=0,
            grid=(n_blocks, hw_blocks),
            in_specs=[
                pl.BlockSpec((tn, C, thw), lambda ni, hi: (ni, 0, hi)),
                pl.BlockSpec((tn, C, 1), lambda ni, hi: (ni, 0, 0)),
                pl.BlockSpec((tn, C, 1), lambda ni, hi: (ni, 0, 0)),
            ],
            out_specs=pl.BlockSpec((tn, C, thw), lambda ni, hi: (ni, 0, hi)),
        ),
        compiler_params=pltpu.CompilerParams(
            dimension_semantics=("parallel", "parallel")),
    )(x, scale3, shift3)

    return out.reshape(N, C, H, W)


# --------------------- parameter setup (plain JAX glue) -----------------------
def orthogonal_init(key, rows, cols):
    """Mimics nn.init.orthogonal_ on a (rows, cols) weight matrix."""
    transpose = rows < cols
    shape = (cols, rows) if transpose else (rows, cols)
    a = jax.random.normal(key, shape, dtype=jnp.float32)
    q, r = jnp.linalg.qr(a)
    q = q * jnp.sign(jnp.diagonal(r))
    if transpose:
        q = q.T
    return q


def spectral_normalize(w, key, n_power_iterations=1, eps=1e-12):
    """Mimics torch.nn.utils.spectral_norm at first forward (one power iter)."""
    # TODO(synk): torch persists the power-iteration vector u across steps; here we
    # regenerate it (setup glue only, not part of the kernel).
    u = jax.random.normal(key, (w.shape[0],), dtype=jnp.float32)
    u = u / (jnp.linalg.norm(u) + eps)
    v = None
    for _ in range(n_power_iterations):
        v = w.T @ u
        v = v / (jnp.linalg.norm(v) + eps)
        u = w @ v
        u = u / (jnp.linalg.norm(u) + eps)
    sigma = u @ (w @ v)
    return w / sigma


# ------------------------------ reference ------------------------------------
def cbn2d_reference(x_nchw, y, w_sn, eps=1e-5):
    x = x_nchw.astype(jnp.float32)
    mean = jnp.mean(x, axis=(0, 2, 3), keepdims=True)
    var = jnp.mean((x - mean) ** 2, axis=(0, 2, 3), keepdims=True)
    x_hat = (x - mean) / jnp.sqrt(var + eps)
    gb = y @ w_sn.T                                  # (N, 2C)
    C = x.shape[1]
    gamma = gb[:, :C][:, :, None, None]
    beta = gb[:, C:][:, :, None, None]
    return (1.0 + gamma) * x_hat + beta


# --------------------------------- main ---------------------------------------
if __name__ == "__main__":
    N, C, H, W = 2, 4, 16, 16        # num_features = C
    K = 8                            # num_conditions

    key = jax.random.PRNGKey(0)
    k_x, k_y, k_w, k_u = jax.random.split(key, 4)

    x = jax.random.normal(k_x, (N, C, H, W), dtype=jnp.float32)
    y = jax.random.normal(k_y, (N, K), dtype=jnp.float32)

    # embed weight: Conv2d(K, 2C, kernel_size=1, bias=False) -> (2C, K)
    w = orthogonal_init(k_w, 2 * C, K)
    w_sn = spectral_normalize(w, k_u)

    out = cbn2d_forward(x, y, w_sn)
    out = jax.block_until_ready(out)

    ref = cbn2d_reference(x, y, w_sn)
    assert out.shape == (N, C, H, W)
    assert jnp.max(jnp.abs(out - ref)) < 1e-4, "mismatch vs reference"

    print("KERNEL_OK")
</pallas_src>

<mosaic_0001>
module attributes {stable_mosaic.version = 11 : i64} {
  func.func @stats_kernel(%arg0: i32, %arg1: i32, %arg2: memref<2x4x256xf32, #tpu.memory_space<vmem>>, %arg3: memref<2x8xf32, #tpu.memory_space<vmem>>, %arg4: memref<8x8xf32, #tpu.memory_space<vmem>>, %arg5: memref<4x2xf32, #tpu.memory_space<vmem>>, %arg6: memref<2x8xf32, #tpu.memory_space<vmem>>) attributes {dimension_semantics = [#tpu.dimension_semantics<arbitrary>, #tpu.dimension_semantics<arbitrary>], iteration_bounds = array<i64: 1, 1>, scalar_prefetch = 0 : i64, scratch_operands = 0 : i64, tpu.core_type = #tpu.core_type<tc>, window_params = [{transform_indices = @transform_0, window_bounds = array<i64: 2, 4, 256>}, {pipeline_mode = #tpu.pipeline_mode<synchronous>, transform_indices = @transform_1, window_bounds = array<i64: 2, 8>}, {pipeline_mode = #tpu.pipeline_mode<synchronous>, transform_indices = @transform_2, window_bounds = array<i64: 8, 8>}, {pipeline_mode = #tpu.pipeline_mode<synchronous>, transform_indices = @transform_3, window_bounds = array<i64: 4, 2>}, {pipeline_mode = #tpu.pipeline_mode<synchronous>, transform_indices = @transform_4, window_bounds = array<i64: 2, 8>}]} {
    %c0_i32 = arith.constant 0 : i32
    %0 = arith.cmpi eq, %arg0, %c0_i32 : i32
    %c0_i32_0 = arith.constant 0 : i32
    %1 = arith.cmpi eq, %arg1, %c0_i32_0 : i32
    %2 = arith.andi %0, %1 : i1
    %3 = arith.extui %2 : i1 to i32
    %c0_i32_1 = arith.constant 0 : i32
    %4 = arith.cmpi ne, %3, %c0_i32_1 : i32
    scf.if %4 {
      %cst_14 = arith.constant 0.000000e+00 : f32
      %19 = vector.broadcast %cst_14 : f32 to vector<4x2xf32>
      %c0_15 = arith.constant 0 : index
      %c0_16 = arith.constant 0 : index
      %20 = vector.load %arg5[%c0_15, %c0_16] : memref<4x2xf32, #tpu.memory_space<vmem>>, vector<4x2xf32>
      tpu.vector_store %arg5[%c0_15, %c0_16], %19 {strides = array<i32>} : memref<4x2xf32, #tpu.memory_space<vmem>>, vector<4x2xf32>,
      %c0_17 = arith.constant 0 : index
      %c0_18 = arith.constant 0 : index
      %21 = vector.load %arg3[%c0_17, %c0_18] : memref<2x8xf32, #tpu.memory_space<vmem>>, vector<2x8xf32>
      %c0_19 = arith.constant 0 : index
      %c0_20 = arith.constant 0 : index
      %22 = vector.load %arg4[%c0_19, %c0_20] : memref<8x8xf32, #tpu.memory_space<vmem>>, vector<8x8xf32>
      %cst_21 = arith.constant dense<0.000000e+00> : vector<2x8xf32>
      %23 = tpu.matmul %21, %22, %cst_21 {dimension_numbers = #tpu.dot_dimension_numbers<[1], [0], [0], [1], [0, 0, 1, 1], [], []>} : vector<2x8xf32>, vector<8x8xf32>, vector<2x8xf32> -> vector<2x8xf32>
      %c0_22 = arith.constant 0 : index
      %c0_23 = arith.constant 0 : index
      %24 = vector.load %arg6[%c0_22, %c0_23] : memref<2x8xf32, #tpu.memory_space<vmem>>, vector<2x8xf32>
      tpu.vector_store %arg6[%c0_22, %c0_23], %23 {strides = array<i32>} : memref<2x8xf32, #tpu.memory_space<vmem>>, vector<2x8xf32>,
    } else {
    }
    %c0 = arith.constant 0 : index
    %c0_2 = arith.constant 0 : index
    %c0_3 = arith.constant 0 : index
    %5 = vector.load %arg2[%c0, %c0_2, %c0_3] : memref<2x4x256xf32, #tpu.memory_space<vmem>>, vector<2x4x256xf32>
    %cst = arith.constant dense<0.000000e+00> : vector<4x256xf32>
    %6 = vector.multi_reduction <add>, %5, %cst [0] : vector<2x4x256xf32> to vector<4x256xf32>
    %7 = arith.mulf %5, %5 : vector<2x4x256xf32>
    %cst_4 = arith.constant dense<0.000000e+00> : vector<4x256xf32>
    %8 = vector.multi_reduction <add>, %7, %cst_4 [0] : vector<2x4x256xf32> to vector<4x256xf32>
    %c0_5 = arith.constant 0 : index
    %c0_6 = arith.constant 0 : index
    %9 = vector.load %arg5[%c0_5, %c0_6] : memref<4x2xf32, #tpu.memory_space<vmem>>, vector<4x1xf32>
    %cst_7 = arith.constant dense<0.000000e+00> : vector<4xf32>
    %10 = vector.multi_reduction <add>, %6, %cst_7 [1] : vector<4x256xf32> to vector<4xf32>
    %11 = vector.shape_cast %10 : vector<4xf32> to vector<4x1xf32>
    %12 = arith.addf %9, %11 : vector<4x1xf32>
    %c0_8 = arith.constant 0 : index
    %c0_9 = arith.constant 0 : index
    %13 = vector.load %arg5[%c0_8, %c0_9] : memref<4x2xf32, #tpu.memory_space<vmem>>, vector<4x1xf32>
    tpu.vector_store %arg5[%c0_8, %c0_9], %12 {strides = array<i32>} : memref<4x2xf32, #tpu.memory_space<vmem>>, vector<4x1xf32>,
    %c0_10 = arith.constant 0 : index
    %c1 = arith.constant 1 : index
    %14 = vector.load %arg5[%c0_10, %c1] : memref<4x2xf32, #tpu.memory_space<vmem>>, vector<4x1xf32>
    %cst_11 = arith.constant dense<0.000000e+00> : vector<4xf32>
    %15 = vector.multi_reduction <add>, %8, %cst_11 [1] : vector<4x256xf32> to vector<4xf32>
    %16 = vector.shape_cast %15 : vector<4xf32> to vector<4x1xf32>
    %17 = arith.addf %14, %16 : vector<4x1xf32>
    %c0_12 = arith.constant 0 : index
    %c1_13 = arith.constant 1 : index
    %18 = vector.load %arg5[%c0_12, %c1_13] : memref<4x2xf32, #tpu.memory_space<vmem>>, vector<4x1xf32>
    tpu.vector_store %arg5[%c0_12, %c1_13], %17 {strides = array<i32>} : memref<4x2xf32, #tpu.memory_space<vmem>>, vector<4x1xf32>,
    return
  }
  func.func @transform_0(%arg0: i32, %arg1: i32) -> (i32, i32, i32) {
    %c0_i32 = arith.constant 0 : i32
    %c0_i32_0 = arith.constant 0 : i32
    return %arg0, %c0_i32, %arg1 : i32, i32, i32
  }
  func.func @transform_1(%arg0: i32, %arg1: i32) -> (i32, i32) {
    %c0_i32 = arith.constant 0 : i32
    %c0_i32_0 = arith.constant 0 : i32
    %c0_i32_1 = arith.constant 0 : i32
    return %c0_i32, %c0_i32_0 : i32, i32
  }
  func.func @transform_2(%arg0: i32, %arg1: i32) -> (i32, i32) {
    %c0_i32 = arith.constant 0 : i32
    %c0_i32_0 = arith.constant 0 : i32
    %c0_i32_1 = arith.constant 0 : i32
    return %c0_i32, %c0_i32_0 : i32, i32
  }
  func.func @transform_3(%arg0: i32, %arg1: i32) -> (i32, i32) {
    %c0_i32 = arith.constant 0 : i32
    %c0_i32_0 = arith.constant 0 : i32
    %c0_i32_1 = arith.constant 0 : i32
    return %c0_i32, %c0_i32_0 : i32, i32
  }
  func.func @transform_4(%arg0: i32, %arg1: i32) -> (i32, i32) {
    %c0_i32 = arith.constant 0 : i32
    %c0_i32_0 = arith.constant 0 : i32
    %c0_i32_1 = arith.constant 0 : i32
    return %c0_i32, %c0_i32_0 : i32, i32
  }
}

</mosaic_0001>

<bundles_post_ra>
// kernel: tpu_custom_call.1
= control target key start
LH: loop header
LB: loop body
LE: loop exit
PB: predicated region body
PF: predicated region fallthrough
CT: control target
= control target key end

     0   :  { %10 = vsyncpa [#allocation3], 0  ;;  %s383_s0 = inlined_call_operand.hbm [shape: f32[2,4,256], index: 0, kind: input, shape index: {}]   ;;  %s384_s1 = inlined_call_operand.hbm [shape: f32[2,8], index: 1, kind: input, shape index: {}]   ;;  %s385_s2 = inlined_call_operand.hbm [shape: f32[8,8], index: 2, kind: input, shape index: {}]   ;;  %s386_s3 = inlined_call_operand.vmem [shape: f32[4,2], index: 3, kind: output, shape index: {0}]   ;;  %s387_s4 = inlined_call_operand.hbm [shape: f32[2,8], index: 4, kind: output, shape index: {1}]  }
   0x1   :  { %11 = vsyncpa [#allocation6], 0 }
   0x2   :  { %12 = vsyncpa [#allocation4], 0  ;;  %s311_s15 = smov [#allocation5]   ;;  %s312_s17 = smov [#allocation2]  }
   0x3   :  { %s31_s16 = sshll.u32 %s311_s15, 4  ;;  %s18_s18 = sshll.u32 %s312_s17, 4  ;;  %s32_s16 = int_to_ptr.vmem [resolvable:$true] %s31_s16  ;;  %s19_s18 = int_to_ptr.vmem [resolvable:$true] %s18_s18 }
   0x4   :  { %s233_s19 = scalar_lea.vmem %s32_s16, 32  ;;  %p238_p1 = scmp.lt.s32.totalorder %s32_s16, %s32_s16 }
   0x5   :  { %p234_p0 = scmp.ne.s32.totalorder %s32_s16, %s233_s19  ;;  %p239_p2 = scmp.lt.s32.totalorder %s233_s19, %s233_s19 }
   0x7   :  { %p240_p3 = por %p239_p2, %p238_p1 }
   0x9   :  { %p241_p4 = pnand %p240_p3, %p234_p0 }
   0xb   :  { %244 = shalt.err (!%p241_p4)
}
   0xc   :  { %34 = dma.hbm_to_vmem [thread:$0]  %s384_s1, 32, %s32_s16, [#allocation6]  }
   0xd   :  { %s253_s22 = scalar_lea.vmem %s19_s18, 256  ;;  %p258_p6 = scmp.lt.s32.totalorder %s19_s18, %s19_s18 }
   0xe   :  { %p254_p5 = scmp.ne.s32.totalorder %s19_s18, %s253_s22  ;;  %p259_p7 = scmp.lt.s32.totalorder %s253_s22, %s253_s22 }
  0x10   :  { %p260_p8 = por %p259_p7, %p258_p6 }
  0x12   :  { %p261_p9 = pnand %p260_p8, %p254_p5 }
  0x14   :  { %264 = shalt.err (!%p261_p9)
}
  0x15   :  { %s313_s23 = smov 128   ;;  %s314_s24 = smov 8  }
  0x16   :  { %24 = dma.hbm_to_vmem [thread:$0]  %s383_s0, 256, %s19_s18, [#allocation3], %s313_s23, %s313_s23, %s314_s24  }
  0x17   :  { %s315_s27 = smov [#allocation7]  }
  0x18   :  { %s41_s28 = sshll.u32 %s315_s27, 4  ;;  %s42_s28 = int_to_ptr.vmem [resolvable:$true] %s41_s28 }
  0x19   :  { %s273_s29 = scalar_lea.vmem %s42_s28, 128  ;;  %p278_p11 = scmp.lt.s32.totalorder %s42_s28, %s42_s28 }
  0x1a   :  { %p274_p10 = scmp.ne.s32.totalorder %s42_s28, %s273_s29  ;;  %p279_p12 = scmp.lt.s32.totalorder %s273_s29, %s273_s29 }
  0x1c   :  { %p280_p13 = por %p279_p12, %p278_p11 }
  0x1e   :  { %p281_p0 = pnand %p280_p13, %p274_p10 }
  0x20   :  { %284 = shalt.err (!%p281_p0)
}
  0x21   :  { %44 = dma.hbm_to_vmem [thread:$0]  %s385_s2, 128, %s42_s28, [#allocation6]  }
  0x22   :  { %305 = dma.done.wait [#allocation3], 256  }
  0x23   :  { %306 = vsyncadd [#allocation3], 4294967040 }
  0x24   :  { %307 = dma.done.wait [#allocation6], 160  }
  0x25   :  { %308 = vsyncadd [#allocation6], 4294967136  ;;  %vm60_vm0 = vcmask 11264   ;;  %v316_v0 = vmov 0.0   ;;  %vm317_vm1 = vmmov 0   ;;  %vm148_vm2 = vcmask 1043456  }
  0x26   :  { %61 = vst.msk [vmem:[%s386_s3] sm:$0xf] %vm60_vm0, %v316_v0  ;;  %210 = vmatprep.subr.mxu0 %v316_v0  ;;  %212 = vmatprep.mubr.msk.f32.mxu0 %vm317_vm1, %v316_v0  ;;  %vm64_vm3 = vcmask 64512   ;;  %v63_v1 = vld [vmem:[#allocation7] sm:$0xff]  ;;  %v62_v2 = vld [vmem:[#allocation5] sm:$0x3] }
  0x27   :  { %v140_v3 = vld [vmem:[#allocation2] sm:$0xff]  ;;  %211 = vmatpush3.msra.mxu0 %v63_v1  ;;  %v141_v4 = vld [vmem:[#allocation2 + $0x8] sm:$0xff]  ;;  %vm176_vm4 = vcmask 3072   ;;  %vm185_vm5 = vcmask 11272   ;;  %s318_s13 = smov [#allocation8]   ;;  %vm138_vm6 = vcmask 58368  }
  0x28   :  { %v144_v5 = vcombine.high %v140_v3, %v140_v3  ;;  %v149_v6 = vsel %vm148_vm2, %v140_v3, 0.0  ;;  %v155_v7 = vmul.f32 %v140_v3, %v140_v3  ;;  %213 = vmatmul.mubr.msk.f32.vlgmr.msra.gmra.mxu0 %vm64_vm3, %v62_v2  ;;  %v145_v8 = vcombine.high %v141_v4, %v141_v4  ;;  %s195_s14 = sshll.u32 %s318_s13, 4  ;;  %s196_s14 = int_to_ptr.vmem [resolvable:$true] %s195_s14 }
  0x29   :  { %v150_v9 = vsel %vm148_vm2, %v141_v4, 0.0  ;;  %v156_v10 = vmul.f32 %v141_v4, %v141_v4  ;;  %s285_s15 = scalar_lea.vmem %s196_s14, 32  ;;  %p290_p2 = scmp.lt.s32.totalorder %s196_s14, %s196_s14 }
  0x2a   :  { %v151_v11 = vadd.f32 %v150_v9, %v149_v6  ;;  %v152_v12 = vsel %vm148_vm2, %v144_v5, 0.0  ;;  %v159_v13 = vcombine.high %v155_v7, %v155_v7  ;;  %v163_v14 = vsel %vm148_vm2, %v155_v7, 0.0  ;;  %p286_p1 = scmp.ne.s32.totalorder %s196_s14, %s285_s15  ;;  %p291_p3 = scmp.lt.s32.totalorder %s285_s15, %s285_s15 }
  0x2b   :  { %v153_v15 = vsel %vm148_vm2, %v145_v8, 0.0  ;;  %v160_v16 = vcombine.high %v156_v10, %v156_v10  ;;  %v164_v17 = vsel %vm148_vm2, %v156_v10, 0.0 }
  0x2c   :  { %v154_v18 = vadd.f32 %v153_v15, %v152_v12  ;;  %v170_v19 = vsel %vm148_vm2, %v151_v11, 0.0  ;;  %v165_v20 = vadd.f32 %v164_v17, %v163_v14  ;;  %v166_v21 = vsel %vm148_vm2, %v159_v13, 0.0  ;;  %p292_p4 = por %p291_p3, %p290_p2 }
  0x2d   :  { %v167_v22 = vsel %vm148_vm2, %v160_v16, 0.0  ;;  %v169_v29 = vld [vmem:[%s386_s3] sm:$0xf] }
  0x2e   :  { %v171_v23 = vsel %vm148_vm2, %v154_v18, 0.0  ;;  %v168_v24 = vadd.f32 %v167_v22, %v166_v21  ;;  %v179_v25 = vsel %vm148_vm2, %v165_v20, 0.0  ;;  %p293_p5 = pnand %p292_p4, %p286_p1 }
  0x2f   :  { %v172_v26 = vadd.f32 %v171_v23, %v170_v19 }
  0x30   :  { %v180_v27 = vsel %vm148_vm2, %v168_v24, 0.0 }
  0x31   :  { %173 = vadd.xlane.f32.xlu0 %v172_v26  ;;  %v181_v28 = vadd.f32 %v180_v27, %v179_v25 }
  0x35   :  { %182 = vadd.xlane.f32.xlu0 %v181_v28 }
  0xba   :  { %v174_v30 = vpop.xlane.xlu0 %173 }
  0xbb   :  { %v175_v31 = vadd.f32 %v174_v30, %v169_v29 }
  0xbd   :  { %177 = vst.msk [vmem:[%s386_s3] sm:$0xf] %vm176_vm4, %v175_v31 }
  0xbe   :  { %v183_v32 = vpop.xlane.xlu0 %182 }
  0xc4   :  { %v178_v33 = vld [vmem:[%s386_s3] sm:$0xf] }
  0xc5   :  { %v184_v34 = vadd.f32 %v183_v32, %v178_v33 }
  0xc7   :  { %186 = vst.msk [vmem:[%s386_s3] sm:$0xf] %vm185_vm5, %v184_v34 }
  0xe8   :  { %v134_v35 = vpop.f32.mrf.mxu0 }
  0xe9   :  { %139 = vst.msk [vmem:[#allocation8] sm:$0x3] %vm138_vm6, %v134_v35 }
  0xea   :  { %v214_v36 = vpop.f32.mrf.mxu0 }
  0xeb   :  { %296 = shalt.err (!%p293_p5)
}
  0xec   :  { %198 = dma.vmem_to_hbm [thread:$0]  %s196_s14, 32, %s387_s4, [#allocation4]  }
  0xed   :  { %309 = dma.done.wait [#allocation4], 32  }
  0xee   :  { %310 = vsyncadd [#allocation4], 4294967264 }
  0xef   :  { %204 = vsyncpa [#allocation3], 1 }
  0xf0   :  { %205 = vsyncpa [#allocation6], 1 }
  0xf1   :  { %206 = vsyncpa [#allocation4], 1 }

</bundles_post_ra>
